<compile_context>
chip_gen: v7x
topology: tpu7x:2x2x1
jax: 0.10.0
libtpu: 0.0.40
codegen_flags: <defaults>
</compile_context>

<pallas_src>
import jax
import jax.numpy as jnp
from jax.experimental import pallas as pl
from jax.experimental.pallas import tpu as pltpu


def _gather_kernel(idx_ref, table_ref, out_ref, sem):
    """Gather table row idx_ref[i] -> output row i; all DMAs kept in flight."""
    n_models = out_ref.shape[0]

    # Phase 1: issue every gather DMA (data-dependent HBM source, HBM dest).
    # Each copy gets its own semaphore slot so waits are unambiguous.
    @pl.loop(0, n_models)
    def _(i):
        pltpu.make_async_copy(
            table_ref.at[idx_ref[i]], out_ref.at[i], sem.at[i]
        ).start()

    # Phase 2: wait for all of them (reconstruct matching descriptors).
    @pl.loop(0, n_models)
    def _(i):
        pltpu.make_async_copy(
            table_ref.at[idx_ref[i]], out_ref.at[i], sem.at[i]
        ).wait()


def grid_embedding_forward(embeddings, indices):
    """embeddings: (n, G+1, G+1, G+1, D), indices: (n_models,) int32.

    Returns embeddings[indices] reshaped to (n_models, G+1, G+1, G+1, D),
    matching the PyTorch module's forward.
    """
    n, g1, _, _, d = embeddings.shape
    s = g1 * g1 * g1
    row = s * d                      # flat, contiguous per-model table row
    n_models = indices.shape[0]

    # Lane-dense, contiguous layout: one table row per model -> (n, S*D).
    # (Free reshape: the source is already contiguous in this order.)
    table = embeddings.reshape(n, row)

    # Bounds safety for the data-dependent DMA source address.
    idx = jnp.clip(indices.astype(jnp.int32), 0, n - 1)

    itemsize = jnp.dtype(embeddings.dtype).itemsize
    bytes_accessed = 2 * n_models * row * itemsize   # read + write per row

    out = pl.pallas_call(
        _gather_kernel,
        out_shape=jax.ShapeDtypeStruct((n_models, row), embeddings.dtype),
        grid_spec=pltpu.PrefetchScalarGridSpec(
            num_scalar_prefetch=1,          # indices land in SMEM
            grid=(1,),                      # single step: no per-model grid overhead
            in_specs=[pl.BlockSpec(memory_space=pl.ANY)],   # table stays in HBM
            out_specs=pl.BlockSpec(memory_space=pl.ANY),    # output written via DMA
            scratch_shapes=[pltpu.SemaphoreType.DMA((n_models,))],
        ),
        compiler_params=pltpu.CompilerParams(
            dimension_semantics=("arbitrary",),
            has_side_effects=True,          # output is produced only via manual DMA
        ),
        cost_estimate=pl.CostEstimate(
            flops=0, transcendentals=0, bytes_accessed=int(bytes_accessed)
        ),
    )(idx, table)

    return out.reshape(n_models, g1, g1, g1, d)


if __name__ == "__main__":
    # Module hyper-parameters (small, consistent with the module's __init__).
    n = 4            # number of embedding tables
    grid_size = 3    # -> (grid_size + 1) = 4 points per spatial axis
    latent_dim = 32

    key = jax.random.PRNGKey(0)
    k_emb, k_idx = jax.random.split(key)

    # Deterministic parameter init (stand-in for torch.randn).
    embeddings = jax.random.normal(
        k_emb,
        (n, grid_size + 1, grid_size + 1, grid_size + 1, latent_dim),
        dtype=jnp.float32,
    )

    # Forward input: a batch of model indices.
    n_models = 2
    indices = jax.random.randint(k_idx, (n_models,), 0, n, dtype=jnp.int32)

    out = grid_embedding_forward(embeddings, indices)
    out = jax.block_until_ready(out)

    # Reference check (pure JAX gather), same semantics as the PyTorch view.
    ref = embeddings[indices].reshape(
        n_models, grid_size + 1, grid_size + 1, grid_size + 1, -1
    )
    assert out.shape == ref.shape
    assert bool(jnp.array_equal(out, ref)), "mismatch vs reference gather"

    print("KERNEL_OK")
</pallas_src>

<mosaic_0001>
module attributes {stable_mosaic.version = 11 : i64} {
  func.func @_gather_kernel(%arg0: i32, %arg1: memref<2xi32, #tpu.memory_space<smem>>, %arg2: memref<4x2048xf32, #tpu.memory_space<any>>, %arg3: memref<2x2048xf32, #tpu.memory_space<any>>, %arg4: memref<2x!tpu.dma_semaphore, #tpu.memory_space<semaphore_mem>>) attributes {dimension_semantics = [#tpu.dimension_semantics<arbitrary>], iteration_bounds = array<i64: 1>, scalar_prefetch = 1 : i64, scratch_operands = 1 : i64, tpu.core_type = #tpu.core_type<tc>, window_params = [{}, {}]} {
    %c0_i32 = arith.constant 0 : i32
    %c2_i32 = arith.constant 2 : i32
    %0 = arith.addi %c0_i32, %c2_i32 : i32
    %c1_i32 = arith.constant 1 : i32
    scf.for %arg5 = %c0_i32 to %0 step %c1_i32  : i32 {
      %c1_i32_5 = arith.constant 1 : i32
      %2 = arith.muli %arg5, %c1_i32_5 : i32
      %c0_i32_6 = arith.constant 0 : i32
      %3 = arith.addi %c0_i32_6, %2 : i32
      %4 = arith.index_cast %3 : i32 to index
      %5 = memref.load %arg1[%4] : memref<2xi32, #tpu.memory_space<smem>>
      %c0_i32_7 = arith.constant 0 : i32
      %6 = tpu.memref_slice %arg2[%5, %c0_i32_7] : memref<4x2048xf32, #tpu.memory_space<any>> -> memref<1x2048xf32, #tpu.memory_space<any>>
      %7 = tpu.memref_squeeze %6 : memref<1x2048xf32, #tpu.memory_space<any>> -> memref<2048xf32, #tpu.memory_space<any>>
      %c0_i32_8 = arith.constant 0 : i32
      %8 = tpu.memref_slice %arg3[%3, %c0_i32_8] : memref<2x2048xf32, #tpu.memory_space<any>> -> memref<1x2048xf32, #tpu.memory_space<any>>
      %9 = tpu.memref_squeeze %8 : memref<1x2048xf32, #tpu.memory_space<any>> -> memref<2048xf32, #tpu.memory_space<any>>
      %10 = tpu.memref_slice %arg4[%3] : memref<2x!tpu.dma_semaphore, #tpu.memory_space<semaphore_mem>> -> memref<1x!tpu.dma_semaphore, #tpu.memory_space<semaphore_mem>>
      %11 = tpu.memref_squeeze %10 : memref<1x!tpu.dma_semaphore, #tpu.memory_space<semaphore_mem>> -> memref<!tpu.dma_semaphore, #tpu.memory_space<semaphore_mem>>
      tpu.enqueue_dma source(%7 : memref<2048xf32, #tpu.memory_space<any>>) target(%9 : memref<2048xf32, #tpu.memory_space<any>>) target_semaphore(%11 : memref<!tpu.dma_semaphore, #tpu.memory_space<semaphore_mem>>)
    }
    %c2_i32_0 = arith.constant 2 : i32
    %c0_i32_1 = arith.constant 0 : i32
    %c2_i32_2 = arith.constant 2 : i32
    %1 = arith.addi %c0_i32_1, %c2_i32_2 : i32
    %c1_i32_3 = arith.constant 1 : i32
    scf.for %arg5 = %c0_i32_1 to %1 step %c1_i32_3  : i32 {
      %c1_i32_5 = arith.constant 1 : i32
      %2 = arith.muli %arg5, %c1_i32_5 : i32
      %c0_i32_6 = arith.constant 0 : i32
      %3 = arith.addi %c0_i32_6, %2 : i32
      %4 = arith.index_cast %3 : i32 to index
      %5 = memref.load %arg1[%4] : memref<2xi32, #tpu.memory_space<smem>>
      %c0_i32_7 = arith.constant 0 : i32
      %6 = tpu.memref_slice %arg2[%5, %c0_i32_7] : memref<4x2048xf32, #tpu.memory_space<any>> -> memref<1x2048xf32, #tpu.memory_space<any>>
      %7 = tpu.memref_squeeze %6 : memref<1x2048xf32, #tpu.memory_space<any>> -> memref<2048xf32, #tpu.memory_space<any>>
      %c0_i32_8 = arith.constant 0 : i32
      %8 = tpu.memref_slice %arg3[%3, %c0_i32_8] : memref<2x2048xf32, #tpu.memory_space<any>> -> memref<1x2048xf32, #tpu.memory_space<any>>
      %9 = tpu.memref_squeeze %8 : memref<1x2048xf32, #tpu.memory_space<any>> -> memref<2048xf32, #tpu.memory_space<any>>
      %10 = tpu.memref_slice %arg4[%3] : memref<2x!tpu.dma_semaphore, #tpu.memory_space<semaphore_mem>> -> memref<1x!tpu.dma_semaphore, #tpu.memory_space<semaphore_mem>>
      %11 = tpu.memref_squeeze %10 : memref<1x!tpu.dma_semaphore, #tpu.memory_space<semaphore_mem>> -> memref<!tpu.dma_semaphore, #tpu.memory_space<semaphore_mem>>
      tpu.wait_dma2 semaphore(%11 : memref<!tpu.dma_semaphore, #tpu.memory_space<semaphore_mem>>) src(%7 : memref<2048xf32, #tpu.memory_space<any>>) dst(%9 : memref<2048xf32, #tpu.memory_space<any>>)
    }
    %c2_i32_4 = arith.constant 2 : i32
    return
  }
}

</mosaic_0001>

<bundles_post_ra>
// kernel: tpu_custom_call.1
= control target key start
LH: loop header
LB: loop body
LE: loop exit
PB: predicated region body
PF: predicated region fallthrough
CT: control target
= control target key end

     0   :  { %s195_s0 = inlined_call_operand.hbm [shape: s32[2], index: 0, kind: input, shape index: {}]   ;;  %s196_s1 = inlined_call_operand.hbm [shape: f32[4,2048], index: 1, kind: input, shape index: {}]   ;;  %s197_s2 = inlined_call_operand.hbm [shape: f32[2,2048], index: 2, kind: output, shape index: {}]  }
   0x1   :  { %s121_s11 = scalar_lea.hbm %s195_s0, 16 }
   0x2   :  { %p122_p0 = scmp.ne.s32.totalorder %s195_s0, %s121_s11  ;;  %p125_p1 = scmp.lt.u32.totalorder %s121_s11, %s195_s0 }
   0x4   :  { %p127_p2 = pnand %p125_p1, %p122_p0 }
   0x6   :  { %130 = shalt.err (!%p127_p2)  }
   0x7   :  { %s151_s16 = smov [#allocation4]  }
   0x8   :  { %8 = dma.hbm_to_smem %s195_s0, 16, %s151_s16, [#allocation3] }
   0x9   :  { %139 = dma.done.wait [#allocation3], 16 }
   0xa   :  { %140 = vsyncadd [#allocation3], 4294967280 }
   0xb   :  { %10 = sfence }
   0xc   :  { %s184_s19 = smov 0  }
   0xd LB: > { %s17_s20 = sld [smem:[#allocation4 + %s145_s19]]  ;;  %s24_s21 = sshrl.u32 %s145_s19, 1  ;;  %s145_s19 = sphi %s184_s19, %s16_s19  }
   0xe   : > { %s25_s22 = sand.u32 1, %s145_s19   ;;  %s95_s23 = sshll.u32 %s24_s21, 5 }
   0xf   : > { %s27_s24 = sadd.s32 %s95_s23, %s25_s22  ;;  %s152_s0 = smov 64  }
  0x10   : > { %s96_s25 = sshll.u32 %s27_s24, 4  ;;  %43 = sst [smem:[#allocation6]] %s152_s0 }
  0x11   : > { %s29_s28 = scalar_lea.hbm %s197_s2, %s96_s25  ;;  %s153_s4 = smov 32  }
  0x12   : > { %45 = sst [smem:[#allocation6 + $0x1]] %s153_s4  ;;  %s154_s6 = smov 1  }
  0x13   : > { %s18_s29 = sshrl.u32 %s17_s20, 2  ;;  %s19_s30 = sand.u32 3, %s17_s20  }
  0x14   : > { %s93_s3 = sshll.u32 %s18_s29, 6  ;;  %47 = sst [smem:[#allocation6 + $0x2]] %s154_s6 }
  0x15   : > { %s21_s5 = sadd.s32 %s93_s3, %s19_s30  ;;  %s30_s11 = scalar_lea.sflag [#allocation2], %s145_s19 }
  0x16   : > { %s94_s7 = sshll.u32 %s21_s5, 4  ;;  %s155_s12 = smov [#allocation5]  }
  0x17   : > { %s23_s10 = scalar_lea.hbm %s196_s1, %s94_s7  ;;  %s156_s13 = smov 0  }
  0x18   : > { %49 = dma.general %s23_s10, 256, %s29_s28, %s30_s11, %s155_s12, [#allocation6], %s156_s13, 0  }
  0x19   : > { %s16_s19 = sadd.s32 1, %s145_s19  }
  0x1a   : > { %p13_p3 = scmp.ge.s32.totalorder %s16_s19, 2  }
  0x1b   :  { %s147_s14 = smov (%p13_p3), 0  }
  0x1c   :  { %15 = sbr.rel (!%p13_p3) target bundleno = 13 (0xd), region = 33 }
  0x23 LB: > { %s57_s15 = scalar_lea.sflag [#allocation2], %s149_s14  ;;  %s149_s14 = sphi %s147_s14, %s55_s14  }
  0x24   : > { %141 = dma.done.wait %s57_s15, 256 }
  0x25   : > { %142 = vsyncadd %s57_s15, 4294967040  ;;  %s55_s14 = sadd.s32 1, %s149_s14  }
  0x26   : > { %p52_p4 = scmp.ge.s32.totalorder %s55_s14, 2  }
  0x28   :  { %54 = sbr.rel (!%p52_p4) target bundleno = 35 (0x23), region = 44 }
  0x2f   :  { %60 = vsyncmov [#allocation2] }
  0x32   :  { %s61_s16 = vpop.sfrf %60 }
  0x33   :  { %p97_p5 = scmp.ne.s32.totalorder %s61_s16, 0 }
  0x35   :  { %65 = shalt.err (%p97_p5)  }
  0x36   :  { %67 = vsyncmov [#allocation2 + $0x1] }
  0x39   :  { %s68_s17 = vpop.sfrf %67 }
  0x3a   :  { %p98_p6 = scmp.ne.s32.totalorder %s68_s17, 0 }
  0x3c   :  { %72 = shalt.err (%p98_p6)  }

</bundles_post_ra>
